<compile_context>
chip_gen: v7x
topology: tpu7x:2x2x1
jax: 0.10.0
libtpu: 0.0.40
codegen_flags: <defaults>
</compile_context>

<pallas_src>
import jax
import jax.numpy as jnp
from jax.experimental import pallas as pl
from jax.experimental.pallas import tpu as pltpu


def _round_up(x, m):
    return ((x + m - 1) // m) * m


def _q_mlp_kernel(s_ref, a_ref, w1s_ref, w1a_ref, b1_ref, w2_ref, b2_ref,
                  w3_ref, b3_ref, o_ref):
    """Fused 3-layer MLP on one (tn, *) row tile, natural (N, D) layout.

        s_ref: (tn, Ds)   a_ref: (tn, Da)    (row tiles of the flat batch)
        h1:    (tn, H1)   h2:    (tn, H2)    (fp32 accumulation)
        o_ref: (tn, 1)
    """
    w_dt = w1s_ref.dtype
    # Layer 1: torch.cat fused as two matmuls against the split W1 row blocks.
    h1 = jnp.dot(s_ref[...].astype(w_dt), w1s_ref[...],
                 preferred_element_type=jnp.float32)
    h1 = h1 + jnp.dot(a_ref[...].astype(w_dt), w1a_ref[...],
                      preferred_element_type=jnp.float32)
    h1 = jnp.maximum(h1 + b1_ref[...], 0.0)          # bias + ReLU on VPU (fp32)

    # Layer 2.
    h2 = jnp.dot(h1.astype(w_dt), w2_ref[...],
                 preferred_element_type=jnp.float32)
    h2 = jnp.maximum(h2 + b2_ref[...], 0.0)

    # Layer 3 (output width 1): VPU multiply + lane (XLU) reduction instead of
    # a 1-column MXU matmul.
    q = jnp.sum(h2 * w3_ref[...], axis=1, keepdims=True) + b3_ref[...]
    o_ref[...] = q.astype(o_ref.dtype)


def pack_q_params(params, state_dim, compute_dtype=jnp.float32):
    """One-time weight packing (hoisted out of the per-call path).

    Splits W1 into its state/action row blocks (fuses the concat into the
    kernel) and casts matmul weights to compute_dtype.  Biases and the width-1
    output layer stay fp32 (they feed VPU ops on fp32 accumulators).
    """
    w1, b1, w2, b2, w3, b3 = params
    h2 = w2.shape[1]
    return (
        w1[:state_dim].astype(compute_dtype),    # (Ds, H1)
        w1[state_dim:].astype(compute_dtype),    # (Da, H1)
        b1.astype(jnp.float32),                  # (1,  H1)
        w2.astype(compute_dtype),                # (H1, H2)
        b2.astype(jnp.float32),                  # (1,  H2)
        w3.reshape(1, h2).astype(jnp.float32),   # (1,  H2) row for VPU multiply
        b3.reshape(1, 1).astype(jnp.float32),    # (1,  1)
    )


def _pick_row_tile(n, tn_max=2048, min_rows_per_step=256):
    """Rows per grid step: large enough to amortize the ~0.35 us/step overhead,
    a multiple of 8 (sublanes), and — once there is enough work — at least two
    steps so the "parallel" grid axis can shard across v7x's 2 TensorCores."""
    tn = min(tn_max, _round_up(n, 8))
    if n >= 2 * min_rows_per_step:
        tn = min(tn, _round_up(pl.cdiv(n, 2), 8))
    return max(tn, 8)


def q_mlp_pallas(state_flat, action_flat, packed_params, *, tn_max=2048):
    """state_flat: (N, Ds), action_flat: (N, Da) -> q: (N,) float32."""
    n, ds = state_flat.shape
    da = action_flat.shape[1]
    w1s, w1a, b1, w2, b2, w3r, b3 = packed_params
    h1 = w1s.shape[1]
    h2 = w2.shape[1]

    tn = _pick_row_tile(n, tn_max)
    # Ragged last tile is fine: rows are independent, so junk in out-of-bounds
    # rows never contaminates valid rows and their writes are dropped.
    grid = (pl.cdiv(n, tn),)

    out = pl.pallas_call(
        _q_mlp_kernel,
        out_shape=jax.ShapeDtypeStruct((n, 1), jnp.float32),
        grid_spec=pltpu.PrefetchScalarGridSpec(
            num_scalar_prefetch=0,
            grid=grid,
            in_specs=[
                pl.BlockSpec((tn, ds), lambda i: (i, 0)),   # state rows (natural layout)
                pl.BlockSpec((tn, da), lambda i: (i, 0)),   # action rows (natural layout)
                pl.BlockSpec((ds, h1), lambda i: (0, 0)),   # W1_state  (resident)
                pl.BlockSpec((da, h1), lambda i: (0, 0)),   # W1_action (resident)
                pl.BlockSpec((1, h1), lambda i: (0, 0)),    # b1
                pl.BlockSpec((h1, h2), lambda i: (0, 0)),   # W2        (resident)
                pl.BlockSpec((1, h2), lambda i: (0, 0)),    # b2
                pl.BlockSpec((1, h2), lambda i: (0, 0)),    # w3 row
                pl.BlockSpec((1, 1), lambda i: (0, 0)),     # b3
            ],
            out_specs=pl.BlockSpec((tn, 1), lambda i: (i, 0)),
        ),
        compiler_params=pltpu.CompilerParams(
            # Row tiles are independent: v7x can shard them over its 2 TCs.
            dimension_semantics=("parallel",),
            # Headroom over v5e's 16 MiB default scoped-VMEM limit; well under
            # physical VMEM on v5e/v6e (128 MiB) and v7x (64 MiB).
            vmem_limit_bytes=32 * 1024 * 1024,
        ),
    )(state_flat, action_flat, w1s, w1a, b1, w2, b2, w3r, b3)
    return out[:, 0]


def make_params(key, state_dim, action_size, hidden_sizes):
    """Deterministic synthetic parameters with the same shapes as MlpModel."""
    sizes = [state_dim + action_size] + list(hidden_sizes) + [1]
    params = []
    for li in range(len(sizes) - 1):
        kw, kb, key = jax.random.split(key, 3)
        fan_in, fan_out = sizes[li], sizes[li + 1]
        scale = 1.0 / jnp.sqrt(jnp.float32(fan_in))
        w = jax.random.uniform(kw, (fan_in, fan_out), jnp.float32, -scale, scale)
        b = jax.random.uniform(kb, (1, fan_out), jnp.float32, -scale, scale)
        params += [w, b]
    return params


def fake_recurrent_q_forward(observation_state, prev_action, prev_reward,
                             action, rnn_state, packed_params):
    """Mirrors FakeRecurrentQModel.forward for (T, B, ...) inputs (lead_dim=2)."""
    T, B = observation_state.shape[0], observation_state.shape[1]
    if action is not None:
        state_flat = observation_state.reshape(T * B, -1)   # cheap view-reshape
        action_flat = action.reshape(T * B, -1)
        q = q_mlp_pallas(state_flat, action_flat, packed_params)   # (T*B,)
    else:
        q = jnp.zeros((T * B,), jnp.float32)
    q = q.reshape(T, B)                                 # restore_leading_dims
    fake_rnn_state = jnp.zeros((1, B, 1), jnp.float32)
    return q, fake_rnn_state


def _reference_forward(observation_state, action, params):
    """Pure-JAX fp32 reference for correctness check."""
    T, B = observation_state.shape[0], observation_state.shape[1]
    x = jnp.concatenate(
        [observation_state.reshape(T * B, -1), action.reshape(T * B, -1)], axis=1)
    w1, b1, w2, b2, w3, b3 = params
    h = jnp.maximum(x @ w1 + b1, 0.0)
    h = jnp.maximum(h @ w2 + b2, 0.0)
    q = h @ w3 + b3
    return q[:, 0].reshape(T, B)


if __name__ == "__main__":
    key = jax.random.PRNGKey(0)

    # Small shapes consistent with the forward pass.
    T, B = 8, 2
    state_dim = 12
    action_size = 4
    hidden_sizes = [32, 32]

    k_obs, k_act, k_par = jax.random.split(key, 3)
    observation_state = jax.random.normal(k_obs, (T, B, state_dim), jnp.float32)
    action = jax.random.normal(k_act, (T, B, action_size), jnp.float32)
    prev_action = jnp.zeros((T, B, action_size), jnp.float32)   # unused by forward
    prev_reward = jnp.zeros((T, B), jnp.float32)                # unused by forward
    rnn_state = jnp.zeros((1, B, 1), jnp.float32)               # unused by forward

    params = make_params(k_par, state_dim, action_size, hidden_sizes)
    # One-time weight packing (review: hoist weight prep out of the call path).
    # TODO(synk): on v5e/v6e pack with compute_dtype=jnp.bfloat16 (and feed bf16
    # activations) purely as a bandwidth optimization; loosen the tolerance.
    packed_params = pack_q_params(params, state_dim)

    q, fake_rnn_state = fake_recurrent_q_forward(
        observation_state, prev_action, prev_reward, action, rnn_state,
        packed_params)
    q = jax.block_until_ready(q)
    fake_rnn_state = jax.block_until_ready(fake_rnn_state)

    assert q.shape == (T, B)
    assert fake_rnn_state.shape == (1, B, 1)

    q_ref = _reference_forward(observation_state, action, params)
    assert jnp.allclose(q, q_ref, atol=1e-5, rtol=1e-4), "mismatch vs reference"

    print("KERNEL_OK")
</pallas_src>

<mosaic_0001>
module attributes {stable_mosaic.version = 11 : i64} {
  func.func @_q_mlp_kernel(%arg0: i32, %arg1: memref<16x12xf32, #tpu.memory_space<vmem>>, %arg2: memref<16x4xf32, #tpu.memory_space<vmem>>, %arg3: memref<12x32xf32, #tpu.memory_space<vmem>>, %arg4: memref<4x32xf32, #tpu.memory_space<vmem>>, %arg5: memref<1x32xf32, #tpu.memory_space<vmem>>, %arg6: memref<32x32xf32, #tpu.memory_space<vmem>>, %arg7: memref<1x32xf32, #tpu.memory_space<vmem>>, %arg8: memref<1x32xf32, #tpu.memory_space<vmem>>, %arg9: memref<1x1xf32, #tpu.memory_space<vmem>>, %arg10: memref<16x1xf32, #tpu.memory_space<vmem>>) attributes {dimension_semantics = [#tpu.dimension_semantics<parallel>], iteration_bounds = array<i64: 1>, scalar_prefetch = 0 : i64, scratch_operands = 0 : i64, tpu.core_type = #tpu.core_type<tc>, window_params = [{transform_indices = @transform_0, window_bounds = array<i64: 16, 12>}, {transform_indices = @transform_1, window_bounds = array<i64: 16, 4>}, {pipeline_mode = #tpu.pipeline_mode<synchronous>, transform_indices = @transform_2, window_bounds = array<i64: 12, 32>}, {pipeline_mode = #tpu.pipeline_mode<synchronous>, transform_indices = @transform_3, window_bounds = array<i64: 4, 32>}, {pipeline_mode = #tpu.pipeline_mode<synchronous>, transform_indices = @transform_4, window_bounds = array<i64: 1, 32>}, {pipeline_mode = #tpu.pipeline_mode<synchronous>, transform_indices = @transform_5, window_bounds = array<i64: 32, 32>}, {pipeline_mode = #tpu.pipeline_mode<synchronous>, transform_indices = @transform_6, window_bounds = array<i64: 1, 32>}, {pipeline_mode = #tpu.pipeline_mode<synchronous>, transform_indices = @transform_7, window_bounds = array<i64: 1, 32>}, {pipeline_mode = #tpu.pipeline_mode<synchronous>, transform_indices = @transform_8, window_bounds = array<i64: 1, 1>}, {transform_indices = @transform_9, window_bounds = array<i64: 16, 1>}]} {
    %c0 = arith.constant 0 : index
    %c0_0 = arith.constant 0 : index
    %0 = vector.load %arg1[%c0, %c0_0] : memref<16x12xf32, #tpu.memory_space<vmem>>, vector<16x12xf32>
    %c0_1 = arith.constant 0 : index
    %c0_2 = arith.constant 0 : index
    %1 = vector.load %arg3[%c0_1, %c0_2] : memref<12x32xf32, #tpu.memory_space<vmem>>, vector<12x32xf32>
    %cst = arith.constant dense<0.000000e+00> : vector<16x32xf32>
    %2 = tpu.matmul %0, %1, %cst {dimension_numbers = #tpu.dot_dimension_numbers<[1], [0], [0], [1], [0, 0, 1, 1], [], []>} : vector<16x12xf32>, vector<12x32xf32>, vector<16x32xf32> -> vector<16x32xf32>
    %c0_3 = arith.constant 0 : index
    %c0_4 = arith.constant 0 : index
    %3 = vector.load %arg2[%c0_3, %c0_4] : memref<16x4xf32, #tpu.memory_space<vmem>>, vector<16x4xf32>
    %c0_5 = arith.constant 0 : index
    %c0_6 = arith.constant 0 : index
    %4 = vector.load %arg4[%c0_5, %c0_6] : memref<4x32xf32, #tpu.memory_space<vmem>>, vector<4x32xf32>
    %cst_7 = arith.constant dense<0.000000e+00> : vector<16x32xf32>
    %5 = tpu.matmul %3, %4, %cst_7 {dimension_numbers = #tpu.dot_dimension_numbers<[1], [0], [0], [1], [0, 0, 1, 1], [], []>} : vector<16x4xf32>, vector<4x32xf32>, vector<16x32xf32> -> vector<16x32xf32>
    %6 = arith.addf %2, %5 : vector<16x32xf32>
    %c0_8 = arith.constant 0 : index
    %c0_9 = arith.constant 0 : index
    %7 = vector.load %arg5[%c0_8, %c0_9] : memref<1x32xf32, #tpu.memory_space<vmem>>, vector<1x32xf32>
    %8 = vector.broadcast %7 : vector<1x32xf32> to vector<16x32xf32>
    %9 = arith.addf %6, %8 : vector<16x32xf32>
    %cst_10 = arith.constant 0.000000e+00 : f32
    %10 = vector.broadcast %cst_10 : f32 to vector<16x32xf32>
    %11 = arith.maximumf %9, %10 : vector<16x32xf32>
    %c0_11 = arith.constant 0 : index
    %c0_12 = arith.constant 0 : index
    %12 = vector.load %arg6[%c0_11, %c0_12] : memref<32x32xf32, #tpu.memory_space<vmem>>, vector<32x32xf32>
    %cst_13 = arith.constant dense<0.000000e+00> : vector<16x32xf32>
    %13 = tpu.matmul %11, %12, %cst_13 {dimension_numbers = #tpu.dot_dimension_numbers<[1], [0], [0], [1], [0, 0, 1, 1], [], []>} : vector<16x32xf32>, vector<32x32xf32>, vector<16x32xf32> -> vector<16x32xf32>
    %c0_14 = arith.constant 0 : index
    %c0_15 = arith.constant 0 : index
    %14 = vector.load %arg7[%c0_14, %c0_15] : memref<1x32xf32, #tpu.memory_space<vmem>>, vector<1x32xf32>
    %15 = vector.broadcast %14 : vector<1x32xf32> to vector<16x32xf32>
    %16 = arith.addf %13, %15 : vector<16x32xf32>
    %cst_16 = arith.constant 0.000000e+00 : f32
    %17 = vector.broadcast %cst_16 : f32 to vector<16x32xf32>
    %18 = arith.maximumf %16, %17 : vector<16x32xf32>
    %c0_17 = arith.constant 0 : index
    %c0_18 = arith.constant 0 : index
    %19 = vector.load %arg8[%c0_17, %c0_18] : memref<1x32xf32, #tpu.memory_space<vmem>>, vector<1x32xf32>
    %20 = vector.broadcast %19 : vector<1x32xf32> to vector<16x32xf32>
    %21 = arith.mulf %18, %20 : vector<16x32xf32>
    %cst_19 = arith.constant dense<0.000000e+00> : vector<16xf32>
    %22 = vector.multi_reduction <add>, %21, %cst_19 [1] : vector<16x32xf32> to vector<16xf32>
    %23 = vector.shape_cast %22 : vector<16xf32> to vector<16x1xf32>
    %c0_20 = arith.constant 0 : index
    %c0_21 = arith.constant 0 : index
    %24 = vector.load %arg9[%c0_20, %c0_21] : memref<1x1xf32, #tpu.memory_space<vmem>>, vector<1x1xf32>
    %25 = vector.broadcast %24 : vector<1x1xf32> to vector<16x1xf32>
    %26 = arith.addf %23, %25 : vector<16x1xf32>
    %c0_22 = arith.constant 0 : index
    %c0_23 = arith.constant 0 : index
    %27 = vector.load %arg10[%c0_22, %c0_23] : memref<16x1xf32, #tpu.memory_space<vmem>>, vector<16x1xf32>
    tpu.vector_store %arg10[%c0_22, %c0_23], %26 {strides = array<i32>} : memref<16x1xf32, #tpu.memory_space<vmem>>, vector<16x1xf32>,
    return
  }
  func.func @transform_0(%arg0: i32) -> (i32, i32) {
    %c0_i32 = arith.constant 0 : i32
    %c0_i32_0 = arith.constant 0 : i32
    return %arg0, %c0_i32 : i32, i32
  }
  func.func @transform_1(%arg0: i32) -> (i32, i32) {
    %c0_i32 = arith.constant 0 : i32
    %c0_i32_0 = arith.constant 0 : i32
    return %arg0, %c0_i32 : i32, i32
  }
  func.func @transform_2(%arg0: i32) -> (i32, i32) {
    %c0_i32 = arith.constant 0 : i32
    %c0_i32_0 = arith.constant 0 : i32
    %c0_i32_1 = arith.constant 0 : i32
    return %c0_i32, %c0_i32_0 : i32, i32
  }
  func.func @transform_3(%arg0: i32) -> (i32, i32) {
    %c0_i32 = arith.constant 0 : i32
    %c0_i32_0 = arith.constant 0 : i32
    %c0_i32_1 = arith.constant 0 : i32
    return %c0_i32, %c0_i32_0 : i32, i32
  }
  func.func @transform_4(%arg0: i32) -> (i32, i32) {
    %c0_i32 = arith.constant 0 : i32
    %c0_i32_0 = arith.constant 0 : i32
    %c0_i32_1 = arith.constant 0 : i32
    return %c0_i32, %c0_i32_0 : i32, i32
  }
  func.func @transform_5(%arg0: i32) -> (i32, i32) {
    %c0_i32 = arith.constant 0 : i32
    %c0_i32_0 = arith.constant 0 : i32
    %c0_i32_1 = arith.constant 0 : i32
    return %c0_i32, %c0_i32_0 : i32, i32
  }
  func.func @transform_6(%arg0: i32) -> (i32, i32) {
    %c0_i32 = arith.constant 0 : i32
    %c0_i32_0 = arith.constant 0 : i32
    %c0_i32_1 = arith.constant 0 : i32
    return %c0_i32, %c0_i32_0 : i32, i32
  }
  func.func @transform_7(%arg0: i32) -> (i32, i32) {
    %c0_i32 = arith.constant 0 : i32
    %c0_i32_0 = arith.constant 0 : i32
    %c0_i32_1 = arith.constant 0 : i32
    return %c0_i32, %c0_i32_0 : i32, i32
  }
  func.func @transform_8(%arg0: i32) -> (i32, i32) {
    %c0_i32 = arith.constant 0 : i32
    %c0_i32_0 = arith.constant 0 : i32
    %c0_i32_1 = arith.constant 0 : i32
    return %c0_i32, %c0_i32_0 : i32, i32
  }
  func.func @transform_9(%arg0: i32) -> (i32, i32) {
    %c0_i32 = arith.constant 0 : i32
    %c0_i32_0 = arith.constant 0 : i32
    return %arg0, %c0_i32 : i32, i32
  }
}

</mosaic_0001>

<bundles_post_ra>
// kernel: tpu_custom_call.1
= control target key start
LH: loop header
LB: loop body
LE: loop exit
PB: predicated region body
PF: predicated region fallthrough
CT: control target
= control target key end

     0   :  { %s628_s0 = inlined_call_operand.hbm [shape: f32[16,12], index: 0, kind: input, shape index: {}]   ;;  %s629_s1 = inlined_call_operand.vmem [shape: f32[16,4], index: 1, kind: input, shape index: {}]   ;;  %s630_s2 = inlined_call_operand.hbm [shape: f32[12,32], index: 2, kind: input, shape index: {}]   ;;  %s631_s3 = inlined_call_operand.vmem [shape: f32[4,32], index: 3, kind: input, shape index: {}]   ;;  %s632_s4 = inlined_call_operand.vmem [shape: f32[1,32], index: 4, kind: input, shape index: {}]   ;;  %s633_s5 = inlined_call_operand.vmem [shape: f32[32,32], index: 5, kind: input, shape index: {}]   ;;  %s634_s6 = inlined_call_operand.vmem [shape: f32[1,32], index: 6, kind: input, shape index: {}]   ;;  %s635_s7 = inlined_call_operand.vmem [shape: f32[1,32], index: 7, kind: input, shape index: {}]   ;;  %s636_s8 = inlined_call_operand.<no memory space> [shape: f32[1,1], index: 8, kind: input, shape index: {}]   ;;  %s637_s9 = inlined_call_operand.vmem [shape: f32[16,1], index: 9, kind: output, shape index: {}]  }
   0x1   :  { %v14_v0 = vstv %s636_s8 }
   0x2   :  { %15 = vst [vmem:[#allocation2] sm:$0x1] %v14_v0 }
   0x3   :  { %16 = vsyncpa [#allocation4], 0 }
   0x4   :  { %17 = vsyncpa [#allocation6], 0  ;;  %s496_s11 = smov [#allocation3]   ;;  %s448_s15 = scalar_lea.hbm %s628_s0, 256 }
   0x5   :  { %s23_s12 = sshll.u32 %s496_s11, 4  ;;  %p449_p0 = scmp.ne.s32.totalorder %s628_s0, %s448_s15  ;;  %s24_s12 = int_to_ptr.vmem [resolvable:$true] %s23_s12 }
   0x6   :  { %p452_p1 = scmp.lt.u32.totalorder %s448_s15, %s628_s0 }
   0x8   :  { %p454_p2 = pnand %p452_p1, %p449_p0 }
   0xa   :  { %457 = shalt.err (!%p454_p2)
}
   0xb   :  { %s458_s8 = scalar_lea.vmem %s24_s12, 256  ;;  %p463_p4 = scmp.lt.s32.totalorder %s24_s12, %s24_s12 }
   0xc   :  { %p459_p3 = scmp.ne.s32.totalorder %s24_s12, %s458_s8  ;;  %p464_p5 = scmp.lt.s32.totalorder %s458_s8, %s458_s8 }
   0xe   :  { %p465_p6 = por %p464_p5, %p463_p4 }
  0x10   :  { %p466_p7 = pnand %p465_p6, %p459_p3 }
  0x12   :  { %469 = shalt.err (!%p466_p7)
}
  0x13   :  { %s497_s20 = smov 128   ;;  %s498_s21 = smov 8  }
  0x14   :  { %29 = dma.hbm_to_vmem [thread:$0]  %s628_s0, 256, %s24_s12, [#allocation4], %s497_s20, %s497_s20, %s498_s21  }
  0x15   :  { %s499_s24 = smov [#allocation5]   ;;  %s470_s28 = scalar_lea.hbm %s630_s2, 256 }
  0x16   :  { %s37_s25 = sshll.u32 %s499_s24, 4  ;;  %p471_p8 = scmp.ne.s32.totalorder %s630_s2, %s470_s28  ;;  %s38_s25 = int_to_ptr.vmem [resolvable:$true] %s37_s25 }
  0x17   :  { %p474_p9 = scmp.lt.u32.totalorder %s470_s28, %s630_s2 }
  0x19   :  { %p476_p10 = pnand %p474_p9, %p471_p8 }
  0x1b   :  { %479 = shalt.err (!%p476_p10)
}
  0x1c   :  { %s480_s13 = scalar_lea.vmem %s38_s25, 256  ;;  %p485_p12 = scmp.lt.s32.totalorder %s38_s25, %s38_s25 }
  0x1d   :  { %p481_p11 = scmp.ne.s32.totalorder %s38_s25, %s480_s13  ;;  %p486_p13 = scmp.lt.s32.totalorder %s480_s13, %s480_s13 }
  0x1f   :  { %p487_p0 = por %p486_p13, %p485_p12 }
  0x21   :  { %p488_p1 = pnand %p487_p0, %p481_p11 }
  0x23   :  { %491 = shalt.err (!%p488_p1)
}
  0x24   :  { %43 = dma.hbm_to_vmem [thread:$0]  %s630_s2, 256, %s38_s25, [#allocation6], %s497_s20, %s497_s20, %s498_s21  }
  0x25   :  { %492 = dma.done.wait [#allocation4], 256  }
  0x26   :  { %493 = vsyncadd [#allocation4], 4294967040 }
  0x27   :  { %494 = dma.done.wait [#allocation6], 256  }
  0x28   :  { %495 = vsyncadd [#allocation6], 4294967040  ;;  %vm76_vm0 = vcmask 1043456   ;;  %vm69_vm1 = vcmask 31744   ;;  %vm500_vm2 = vmmov 1   ;;  %v66_v3 = vld [vmem:[%s629_s1] sm:$0xff] }
  0x29   :  { %vm578_vm3 = vmpackc.low %vm76_vm0, %vm500_vm2  ;;  %v68_v2 = vld [vmem:[%s631_s3] sm:$0xf]  ;;  %v67_v4 = vld [vmem:[%s629_s1 + $0x8] sm:$0xff]  ;;  %406 = vmatprep.mubr.msk.f32.mxu0 %vm69_vm1, %v66_v3  ;;  %vm155_vm4 = vcmask 97280   ;;  %vm262_vm5 = vcmask 261120   ;;  %vm370_vm6 = vcmask 7168  }
  0x2a   :  { %404 = vmatprep.subr.msk.mxu0 %vm76_vm0, %v68_v2  ;;  %v64_v5 = vld [vmem:[#allocation5] sm:$0xff]  ;;  %v65_v6 = vld [vmem:[#allocation5 + $0x8] sm:$0xf]  ;;  %v62_v7 = vld [vmem:[#allocation3] sm:$0xff] }
  0x2b   :  { %405 = vmatpush3.msk.msra.mxu0 %vm76_vm0, %v68_v2  ;;  %v427_v8 = vpack.c.bf16 %v65_v6, %v64_v5  ;;  %v251_v9 = vld [vmem:[%s633_s5] sm:$0xff]  ;;  %v252_v10 = vld [vmem:[%s633_s5 + $0x8] sm:$0xff]  ;;  %v253_v13 = vld [vmem:[%s633_s5 + $0x10] sm:$0xff] }
  0x2c   :  { %407 = vmatmul.mubr.msk.f32.vlgmr.msra.gmra.mrb[0].mxu0 %vm69_vm1, %v67_v4  ;;  %v433_v11 = vpack.c.bf16 %v252_v10, %v251_v9  ;;  %v63_v12 = vld [vmem:[#allocation3 + $0x8] sm:$0xff]  ;;  %v254_v14 = vld [vmem:[%s633_s5 + $0x18] sm:$0xff]  ;;  %v385_v16 = vld [vmem:[%s632_s4] ss:$0 sm:$0xff] }
  0x2d   :  { %429 = vmatprep.subr.msk.bf16.mxu0 %vm578_vm3, %v427_v8  ;;  %413 = vmatprep.mubr.msk.f32.mxu0 %vm155_vm4, %v62_v7  ;;  %v437_v15 = vpack.c.bf16 %v254_v14, %v253_v13  ;;  %v386_v23 = vld [vmem:[%s634_s6] ss:$0 sm:$0xff] }
  0x2e   :  { %432 = vmatpush3.bf16.msk.msra.mxu0 %vm578_vm3, %v427_v8  ;;  %434 = vmatprep.subr.bf16.mxu1 %v433_v11  ;;  %v389_v28 = vld [vmem:[%s635_s7] ss:$0 sm:$0xff] }
  0x2f   :  { %436 = vmatpush3.bf16.msra.mxu1 %v433_v11  ;;  %v390_v35 = vld [vmem:[#allocation2] ss:$0 sm:$0xff] }
  0x30   :  { %438 = vmatprep.subr.bf16.mxu1 %v437_v15 }
  0x33   :  { %440 = vmatpush3.bf16.msra.mxu1 %v437_v15 }
  0x34   :  { %414 = vmatmul.mubr.msk.f32.vlgmr.msra.gmra.mrb[0].mxu0 %vm155_vm4, %v63_v12 }
 0x107   :  { %v415_v17 = vpop.f32.mrb[0].mxu0 }
 0x108   :  { %v248_v18 = vadd.f32 %v415_v17, %v385_v16  ;;  %v231_v19 = vpop.f32.mrb[1].mxu0 }
 0x109   :  { %v247_v20 = vadd.f32 %v385_v16, %v231_v19 }
 0x10a   :  { %v250_v22 = vmax.f32 %v248_v18, 0.0 }
 0x10b   :  { %v249_v21 = vmax.f32 %v247_v20, 0.0 }
 0x10d   :  { %424 = vmatprep.mubr.msk.f32.mxu1 %vm262_vm5, %v249_v21 }
 0x10e   :  { %425 = vmatmul.mubr.msk.f32.vlgmr.msra.gmra.mrb[0].mxu1 %vm262_vm5, %v250_v22 }
 0x1e1   :  { %v426_v24 = vpop.f32.mrb[0].mxu1 }
 0x1e2   :  { %v341_v25 = vadd.f32 %v426_v24, %v386_v23  ;;  %v335_v26 = vpop.f32.mrb[1].mxu1 }
 0x1e3   :  { %v336_v27 = vadd.f32 %v386_v23, %v335_v26 }
 0x1e4   :  { %v345_v29 = vmax.f32 %v341_v25, 0.0 }
 0x1e5   :  { %v344_v30 = vmax.f32 %v336_v27, 0.0 }
 0x1e6   :  { %v354_v33 = vmul.f32 %v389_v28, %v345_v29 }
 0x1e7   :  { %v353_v31 = vmul.f32 %v389_v28, %v344_v30 }
 0x1e8   :  { %v358_v34 = vsel %vm262_vm5, %v354_v33, 0.0 }
 0x1e9   :  { %v355_v32 = vsel %vm262_vm5, %v353_v31, 0.0 }
 0x1ea   :  { %356 = vadd.xlane.f32.xlu0 %v355_v32 }
 0x1ee   :  { %359 = vadd.xlane.f32.xlu0 %v358_v34 }
 0x277   :  { %v357_v36 = vpop.xlane.xlu0 %356 }
 0x278   :  { %v368_v37 = vadd.f32 %v390_v35, %v357_v36 }
 0x27a   :  { %371 = vst.msk [vmem:[%s637_s9] sm:$0xff] %vm370_vm6, %v368_v37 }
 0x27b   :  { %v360_v38 = vpop.xlane.xlu0 %359 }
 0x27c   :  { %v369_v39 = vadd.f32 %v390_v35, %v360_v38 }
 0x27e   :  { %372 = vst.msk [vmem:[%s637_s9 + $0x8] sm:$0xff] %vm370_vm6, %v369_v39 }
 0x27f   :  { %377 = vsyncpa [#allocation4], 1 }
 0x280   :  { %378 = vsyncpa [#allocation6], 1 }

</bundles_post_ra>
